<compile_context>
chip_gen: v7x
topology: tpu7x:2x2x1
jax: 0.10.0
libtpu: 0.0.40
codegen_flags: <defaults>
</compile_context>

<pallas_src>
import functools

import jax
import jax.numpy as jnp
from jax import lax
from jax.experimental import pallas as pl
from jax.experimental.pallas import tpu as pltpu


def _addnorm_kernel(x_ref, y_ref, g_ref, b_ref, o_ref, *, eps: float, inv_d: float):
    # x_ref / y_ref / o_ref: (D, TILE_R) with rows on lanes; g_ref / b_ref: (D, 1).
    z = x_ref[...].astype(jnp.float32) + y_ref[...].astype(jnp.float32)
    mu = jnp.sum(z, axis=0, keepdims=True) * inv_d           # sublane reduce -> (1, T)
    zc = z - mu
    var = jnp.sum(zc * zc, axis=0, keepdims=True) * inv_d
    inv = lax.rsqrt(var + eps)                               # EUP rsqrt, no VALU divide
    g = g_ref[...].astype(jnp.float32)
    b = b_ref[...].astype(jnp.float32)
    o_ref[...] = (zc * inv * g + b).astype(o_ref.dtype)


def _pick_tile(r: int, max_tile: int = 8192) -> int:
    # Largest lane-dense tile (multiple of 128) that divides R; whole R otherwise
    # (legal: a block dim equal to the full array extent is always accepted).
    t = max_tile
    while t >= 128:
        if r % t == 0:
            return t
        t //= 2
    return r


def add_norm_dr(xt, yt, gamma, beta, *, eps: float = 1e-5):
    """AddNorm on lane-dense (D, R) slabs: LayerNorm over D of (yt + xt)."""
    D, R = xt.shape
    tile = _pick_tile(R)
    g = gamma.reshape(D, 1)
    b = beta.reshape(D, 1)
    row_spec = pl.BlockSpec((D, tile), lambda i: (0, i))
    const_spec = pl.BlockSpec((D, 1), lambda i: (0, 0))      # resident across grid
    return pl.pallas_call(
        functools.partial(_addnorm_kernel, eps=eps, inv_d=1.0 / D),
        out_shape=jax.ShapeDtypeStruct((D, R), xt.dtype),
        grid=(R // tile,),
        in_specs=[row_spec, row_spec, const_spec, const_spec],
        out_specs=row_spec,
        compiler_params=pltpu.CompilerParams(
            dimension_semantics=("parallel",),               # shard rows over v7x's 2 TCs
        ),
    )(xt, yt, g, b)


def add_norm(x, y, gamma, beta, *, eps: float = 1e-5):
    """(B, S, D)-compatible wrapper: LayerNorm(Y + X) over the last (embed_dim) axis."""
    B, S, D = x.shape
    R = B * S
    # Layout plumbing: put the long R axis on lanes.  In a real model the caller
    # would carry the residual stream in (D, R) layout and call add_norm_dr directly.
    xt = x.reshape(R, D).T
    yt = y.reshape(R, D).T
    out_t = add_norm_dr(xt, yt, gamma, beta, eps=eps)        # (D, R)
    return out_t.T.reshape(B, S, D)


def _reference(x, y, gamma, beta, eps=1e-5):
    """Pure-JAX reference mirroring the PyTorch forward: LayerNorm(Y + X)."""
    z = x + y
    mu = jnp.mean(z, axis=-1, keepdims=True)
    var = jnp.mean((z - mu) ** 2, axis=-1, keepdims=True)
    return (z - mu) / jnp.sqrt(var + eps) * gamma + beta


if __name__ == "__main__":
    # Shapes implied by the module: embed_dim=32, seq=8, batch=2.
    B, S, D = 2, 8, 32
    key = jax.random.PRNGKey(0)
    kx, ky, kg, kb = jax.random.split(key, 4)

    x = jax.random.normal(kx, (B, S, D), jnp.float32)
    y = jax.random.normal(ky, (B, S, D), jnp.float32)
    gamma = 1.0 + 0.1 * jax.random.normal(kg, (D,), jnp.float32)
    beta = 0.05 * jax.random.normal(kb, (D,), jnp.float32)

    # f32 I/O path: exact check against the pure-JAX reference.
    out = jax.block_until_ready(add_norm(x, y, gamma, beta))
    ref = _reference(x, y, gamma, beta)
    assert out.shape == (B, S, D)
    assert jnp.allclose(out, ref, atol=1e-4, rtol=1e-4), "f32 mismatch vs reference"

    # bf16 I/O path (halved HBM bytes; statistics still f32 inside the kernel).
    xb = x.astype(jnp.bfloat16)
    yb = y.astype(jnp.bfloat16)
    out_b = jax.block_until_ready(add_norm(xb, yb, gamma, beta))
    ref_b = _reference(xb.astype(jnp.float32), yb.astype(jnp.float32), gamma, beta)
    assert out_b.dtype == jnp.bfloat16
    assert jnp.allclose(out_b.astype(jnp.float32), ref_b, atol=5e-2, rtol=5e-2), (
        "bf16 mismatch vs reference"
    )

    print("KERNEL_OK")
</pallas_src>

<mosaic_0001>
module attributes {stable_mosaic.version = 11 : i64} {
  func.func @_addnorm_kernel(%arg0: i32, %arg1: memref<32x16xf32, #tpu.memory_space<vmem>>, %arg2: memref<32x16xf32, #tpu.memory_space<vmem>>, %arg3: memref<32x1xf32, #tpu.memory_space<vmem>>, %arg4: memref<32x1xf32, #tpu.memory_space<vmem>>, %arg5: memref<32x16xf32, #tpu.memory_space<vmem>>) attributes {dimension_semantics = [#tpu.dimension_semantics<parallel>], iteration_bounds = array<i64: 1>, scalar_prefetch = 0 : i64, scratch_operands = 0 : i64, tpu.core_type = #tpu.core_type<tc>, window_params = [{transform_indices = @transform_0, window_bounds = array<i64: 32, 16>}, {transform_indices = @transform_1, window_bounds = array<i64: 32, 16>}, {pipeline_mode = #tpu.pipeline_mode<synchronous>, transform_indices = @transform_2, window_bounds = array<i64: 32, 1>}, {pipeline_mode = #tpu.pipeline_mode<synchronous>, transform_indices = @transform_3, window_bounds = array<i64: 32, 1>}, {transform_indices = @transform_4, window_bounds = array<i64: 32, 16>}]} {
    %c0 = arith.constant 0 : index
    %c0_0 = arith.constant 0 : index
    %0 = vector.load %arg1[%c0, %c0_0] : memref<32x16xf32, #tpu.memory_space<vmem>>, vector<32x16xf32>
    %c0_1 = arith.constant 0 : index
    %c0_2 = arith.constant 0 : index
    %1 = vector.load %arg2[%c0_1, %c0_2] : memref<32x16xf32, #tpu.memory_space<vmem>>, vector<32x16xf32>
    %2 = arith.addf %0, %1 : vector<32x16xf32>
    %cst = arith.constant dense<0.000000e+00> : vector<16xf32>
    %3 = vector.multi_reduction <add>, %2, %cst [0] : vector<32x16xf32> to vector<16xf32>
    %4 = vector.shape_cast %3 : vector<16xf32> to vector<1x16xf32>
    %cst_3 = arith.constant 3.125000e-02 : f32
    %5 = vector.broadcast %cst_3 : f32 to vector<1x16xf32>
    %6 = arith.mulf %4, %5 : vector<1x16xf32>
    %7 = vector.broadcast %6 : vector<1x16xf32> to vector<32x16xf32>
    %8 = arith.subf %2, %7 : vector<32x16xf32>
    %9 = arith.mulf %8, %8 : vector<32x16xf32>
    %cst_4 = arith.constant dense<0.000000e+00> : vector<16xf32>
    %10 = vector.multi_reduction <add>, %9, %cst_4 [0] : vector<32x16xf32> to vector<16xf32>
    %11 = vector.shape_cast %10 : vector<16xf32> to vector<1x16xf32>
    %cst_5 = arith.constant 3.125000e-02 : f32
    %12 = vector.broadcast %cst_5 : f32 to vector<1x16xf32>
    %13 = arith.mulf %11, %12 : vector<1x16xf32>
    %cst_6 = arith.constant 9.99999974E-6 : f32
    %14 = vector.broadcast %cst_6 : f32 to vector<1x16xf32>
    %15 = arith.addf %13, %14 : vector<1x16xf32>
    %16 = math.rsqrt %15 : vector<1x16xf32>
    %c0_7 = arith.constant 0 : index
    %c0_8 = arith.constant 0 : index
    %17 = vector.load %arg3[%c0_7, %c0_8] : memref<32x1xf32, #tpu.memory_space<vmem>>, vector<32x1xf32>
    %c0_9 = arith.constant 0 : index
    %c0_10 = arith.constant 0 : index
    %18 = vector.load %arg4[%c0_9, %c0_10] : memref<32x1xf32, #tpu.memory_space<vmem>>, vector<32x1xf32>
    %19 = vector.broadcast %16 : vector<1x16xf32> to vector<32x16xf32>
    %20 = arith.mulf %8, %19 : vector<32x16xf32>
    %21 = vector.broadcast %17 : vector<32x1xf32> to vector<32x16xf32>
    %22 = arith.mulf %20, %21 : vector<32x16xf32>
    %23 = vector.broadcast %18 : vector<32x1xf32> to vector<32x16xf32>
    %24 = arith.addf %22, %23 : vector<32x16xf32>
    %c0_11 = arith.constant 0 : index
    %c0_12 = arith.constant 0 : index
    %25 = vector.load %arg5[%c0_11, %c0_12] : memref<32x16xf32, #tpu.memory_space<vmem>>, vector<32x16xf32>
    tpu.vector_store %arg5[%c0_11, %c0_12], %24 {strides = array<i32>} : memref<32x16xf32, #tpu.memory_space<vmem>>, vector<32x16xf32>,
    return
  }
  func.func @transform_0(%arg0: i32) -> (i32, i32) {
    %c0_i32 = arith.constant 0 : i32
    %c0_i32_0 = arith.constant 0 : i32
    return %c0_i32, %arg0 : i32, i32
  }
  func.func @transform_1(%arg0: i32) -> (i32, i32) {
    %c0_i32 = arith.constant 0 : i32
    %c0_i32_0 = arith.constant 0 : i32
    return %c0_i32, %arg0 : i32, i32
  }
  func.func @transform_2(%arg0: i32) -> (i32, i32) {
    %c0_i32 = arith.constant 0 : i32
    %c0_i32_0 = arith.constant 0 : i32
    %c0_i32_1 = arith.constant 0 : i32
    return %c0_i32, %c0_i32_0 : i32, i32
  }
  func.func @transform_3(%arg0: i32) -> (i32, i32) {
    %c0_i32 = arith.constant 0 : i32
    %c0_i32_0 = arith.constant 0 : i32
    %c0_i32_1 = arith.constant 0 : i32
    return %c0_i32, %c0_i32_0 : i32, i32
  }
  func.func @transform_4(%arg0: i32) -> (i32, i32) {
    %c0_i32 = arith.constant 0 : i32
    %c0_i32_0 = arith.constant 0 : i32
    return %c0_i32, %arg0 : i32, i32
  }
}

</mosaic_0001>

<bundles_post_ra>
// kernel: tpu_custom_call.1
= control target key start
LH: loop header
LB: loop body
LE: loop exit
PB: predicated region body
PF: predicated region fallthrough
CT: control target
= control target key end

     0   :  { %v141_v0 = vmov 0   ;;  %vm29_vm0 = vcmask 130048   ;;  %s239_s2 = inlined_call_operand.vmem [shape: f32[32,1], index: 2, kind: input, shape index: {}]   ;;  %s240_s3 = inlined_call_operand.vmem [shape: f32[32,1], index: 3, kind: input, shape index: {}]   ;;  %s241_s0 = inlined_call_operand.vmem [shape: f32[32,16], index: 0, kind: input, shape index: {}]   ;;  %s242_s1 = inlined_call_operand.vmem [shape: f32[32,16], index: 1, kind: input, shape index: {}]   ;;  %s243_s4 = inlined_call_operand.vmem [shape: f32[32,16], index: 4, kind: output, shape index: {}]  }
   0x1   :  { %138 = vset.pattern.permute.xlu1 %v141_v0  ;;  %137 = vset.pattern.permute.xlu0 %v141_v0  ;;  %v70_v1 = vld [vmem:[%s239_s2 + $0x10] sm:$0xff]  ;;  %v68_v2 = vld [vmem:[%s239_s2] sm:$0xff]  ;;  %v71_v3 = vld [vmem:[%s239_s2 + $0x18] sm:$0xff] }
   0x2   :  { %92 = vperm.xlu1 %138, %v70_v1   ;;  %82 = vperm.xlu0 %137, %v68_v2   ;;  %v69_v4 = vld [vmem:[%s239_s2 + $0x8] sm:$0xff]  ;;  %v72_v6 = vld [vmem:[%s240_s3] sm:$0xff]  ;;  %v75_v7 = vld [vmem:[%s240_s3 + $0x18] sm:$0xff] }
   0x3   :  { %v73_v5 = vld [vmem:[%s240_s3 + $0x8] sm:$0xff]  ;;  %v74_v8 = vld [vmem:[%s240_s3 + $0x10] sm:$0xff]  ;;  %v17_v9 = vld [vmem:[%s241_s0] sm:$0xff] }
   0x4   :  { %v18_v10 = vld [vmem:[%s241_s0 + $0x8] sm:$0xff]  ;;  %v21_v11 = vld [vmem:[%s242_s1] sm:$0xff]  ;;  %v19_v15 = vld [vmem:[%s241_s0 + $0x10] sm:$0xff] }
   0x5   :  { %v22_v12 = vld [vmem:[%s242_s1 + $0x8] sm:$0xff]  ;;  %v25_v13 = vadd.f32 %v21_v11, %v17_v9  ;;  %v23_v16 = vld [vmem:[%s242_s1 + $0x10] sm:$0xff]  ;;  %v20_v20 = vld [vmem:[%s241_s0 + $0x18] sm:$0xff] }
   0x6   :  { %97 = vperm.xlu1 %138, %v71_v3   ;;  %87 = vperm.xlu0 %137, %v69_v4   ;;  %v26_v14 = vadd.f32 %v22_v12, %v18_v10  ;;  %v27_v17 = vadd.f32 %v23_v16, %v19_v15  ;;  %v24_v21 = vld [vmem:[%s242_s1 + $0x18] sm:$0xff] }
   0x7   :  { %v30_v18 = vsel %vm29_vm0, %v25_v13, 0.0  ;;  %v28_v23 = vadd.f32 %v24_v21, %v20_v20 }
   0x8   :  { %v31_v19 = vsel %vm29_vm0, %v26_v14, 0.0  ;;  %v33_v24 = vsel %vm29_vm0, %v27_v17, 0.0 }
   0x9   :  { %v32_v22 = vadd.f32 %v31_v19, %v30_v18  ;;  %v35_v26 = vsel %vm29_vm0, %v28_v23, 0.0 }
   0xa   :  { %111 = vperm.xlu1 %138, %v73_v5   ;;  %106 = vperm.xlu0 %137, %v72_v6  }
   0xb   :  { %v34_v25 = vadd.f32 %v33_v24, %v32_v22 }
   0xd   :  { %v36_v27 = vadd.f32 %v35_v26, %v34_v25 }
   0xe   :  { %121 = vperm.xlu1 %138, %v75_v7   ;;  %116 = vperm.xlu0 %137, %v74_v8  }
   0xf   :  { %v37_v28 = vrot.slane %v36_v27, 4 }
  0x11   :  { %v38_v29 = vadd.f32 %v37_v28, %v36_v27 }
  0x13   :  { %v39_v30 = vrot.slane %v38_v29, 2 }
  0x15   :  { %v40_v31 = vadd.f32 %v39_v30, %v38_v29 }
  0x17   :  { %v41_v32 = vrot.slane %v40_v31, 1 }
  0x19   :  { %v42_v33 = vadd.f32 %v41_v32, %v40_v31 }
  0x1b   :  { %v43_v34 = vmul.f32 0.03125, %v42_v33 }
  0x1d   :  { %v44_v35 = vsub.f32 %v25_v13, %v43_v34  ;;  %v45_v36 = vsub.f32 %v26_v14, %v43_v34  ;;  %v46_v37 = vsub.f32 %v27_v17, %v43_v34  ;;  %v47_v40 = vsub.f32 %v28_v23, %v43_v34 }
  0x1f   :  { %v48_v38 = vmul.f32 %v44_v35, %v44_v35  ;;  %v49_v39 = vmul.f32 %v45_v36, %v45_v36  ;;  %v50_v41 = vmul.f32 %v46_v37, %v46_v37  ;;  %v51_v45 = vmul.f32 %v47_v40, %v47_v40 }
  0x21   :  { %v52_v42 = vsel %vm29_vm0, %v48_v38, 0.0  ;;  %v53_v43 = vsel %vm29_vm0, %v49_v39, 0.0  ;;  %v55_v46 = vsel %vm29_vm0, %v50_v41, 0.0  ;;  %v57_v48 = vsel %vm29_vm0, %v51_v45, 0.0 }
  0x22   :  { %v54_v44 = vadd.f32 %v53_v43, %v52_v42 }
  0x24   :  { %v56_v47 = vadd.f32 %v55_v46, %v54_v44 }
  0x26   :  { %v58_v49 = vadd.f32 %v57_v48, %v56_v47 }
  0x28   :  { %v59_v50 = vrot.slane %v58_v49, 4 }
  0x2a   :  { %v60_v51 = vadd.f32 %v59_v50, %v58_v49 }
  0x2c   :  { %v61_v52 = vrot.slane %v60_v51, 2 }
  0x2e   :  { %v62_v53 = vadd.f32 %v61_v52, %v60_v51 }
  0x30   :  { %v63_v54 = vrot.slane %v62_v53, 1 }
  0x32   :  { %v64_v55 = vadd.f32 %v63_v54, %v62_v53 }
  0x34   :  { %v65_v56 = vmul.f32 0.03125, %v64_v55 }
  0x36   :  { %v66_v57 = vadd.f32 1e-05, %v65_v56 }
  0x38   :  { %139 = vrsqrt.f32 %v66_v57 }
  0x42   :  { %v140_v58 = vpop.eup %139 }
  0x43   :  { %v76_v61 = vmul.f32 %v140_v58, %v44_v35  ;;  %v77_v62 = vmul.f32 %v140_v58, %v45_v36  ;;  %v78_v1 = vmul.f32 %v140_v58, %v46_v37  ;;  %v79_v3 = vmul.f32 %v140_v58, %v47_v40 }
  0x81   :  { %v93_v59 = vpop.permute.xlu1 %92  ;;  %v83_v60 = vpop.permute.xlu0 %82 }
  0x82   :  { %v100_v2 = vmul.f32 %v83_v60, %v76_v61  ;;  %v102_v9 = vmul.f32 %v93_v59, %v78_v1 }
  0x85   :  { %v98_v63 = vpop.permute.xlu1 %97  ;;  %v88_v0 = vpop.permute.xlu0 %87 }
  0x86   :  { %v101_v4 = vmul.f32 %v88_v0, %v77_v62  ;;  %v103_v10 = vmul.f32 %v98_v63, %v79_v3 }
  0x89   :  { %v112_v5 = vpop.permute.xlu1 %111  ;;  %v107_v6 = vpop.permute.xlu0 %106 }
  0x8a   :  { %v125_v7 = vadd.f32 %v112_v5, %v101_v4  ;;  %v124_v8 = vadd.f32 %v107_v6, %v100_v2 }
  0x8c   :  { %129 = vst.msk [vmem:[%s243_s4 + $0x8] sm:$0xff] %vm29_vm0, %v125_v7  ;;  %128 = vst.msk [vmem:[%s243_s4] sm:$0xff] %vm29_vm0, %v124_v8 }
  0x8d   :  { %v122_v11 = vpop.permute.xlu1 %121  ;;  %v117_v12 = vpop.permute.xlu0 %116 }
  0x8e   :  { %v127_v13 = vadd.f32 %v122_v11, %v103_v10  ;;  %v126_v14 = vadd.f32 %v117_v12, %v102_v9 }
  0x90   :  { %131 = vst.msk [vmem:[%s243_s4 + $0x18] sm:$0xff] %vm29_vm0, %v127_v13  ;;  %130 = vst.msk [vmem:[%s243_s4 + $0x10] sm:$0xff] %vm29_vm0, %v126_v14 }

</bundles_post_ra>
